<compile_context>
chip_gen: v7x
topology: tpu7x:2x2x1
jax: 0.10.0
libtpu: 0.0.40
codegen_flags: <defaults>
</compile_context>

<pallas_src>
import functools

import jax
import jax.numpy as jnp
from jax.experimental import pallas as pl
from jax.experimental.pallas import tpu as pltpu


def _rmsnorm_kernel(x_ref, w_ref, o_ref, *, eps, inv_hidden):
    # x_ref: (block_rows, H) activation tile; w_ref: (1, H) f32 weight; o_ref: (block_rows, H)
    x = x_ref[...].astype(jnp.float32)                        # hidden_states.to(float32)
    # sum * (1/true_hidden) == mean over the real hidden size even with zero lane padding.
    var = jnp.sum(x * x, axis=-1, keepdims=True) * inv_hidden  # pow(2).mean(-1)   (XLU)
    inv = jax.lax.rsqrt(var + eps)                             # rsqrt(var + eps)  (EUP)
    # Scale in f32, single cast at the store. (With an f32 weight and bf16 input this
    # differs from strict PyTorch promotion by one bf16 rounding, but keeps
    # output dtype == input dtype, the usual HF convention.)
    o_ref[...] = (w_ref[...] * (x * inv)).astype(o_ref.dtype)


def _sublane(dtype) -> int:
    # Packed sublane tile: (8,128) f32, (16,128) bf16, (32,128) int8/fp8.
    return {4: 8, 2: 16, 1: 32}.get(jnp.dtype(dtype).itemsize, 8)


@functools.lru_cache(maxsize=None)
def _vmem_capacity_bytes() -> int:
    try:
        cap = int(pltpu.get_tpu_info().vmem_capacity_bytes)
        if cap > 0:
            return cap
    except Exception:
        pass
    return 64 * 1024 * 1024  # conservative fallback: v7x per-TensorCore VMEM


@functools.lru_cache(maxsize=None)
def _tensorcores_per_chip() -> int:
    try:
        info = pltpu.get_tpu_info()
    except Exception:
        return 1
    for name in ("num_tensorcores", "tensorcores_per_chip", "cores_per_chip", "num_cores"):
        v = getattr(info, name, None)
        if v is None:
            continue
        try:
            v = int(v)
        except Exception:
            continue
        if v > 0:
            return v
    return 1


def _pick_block_rows(rows, hidden_p, dtype, tile_budget_bytes, row_cap):
    """Largest row tile (multiple of the packed sublane tile) whose working set
    (2x in + 2x out pipeline buffers plus ~2 live f32 temporaries) fits the budget."""
    itemsize = jnp.dtype(dtype).itemsize
    sub = _sublane(dtype)
    per_row = hidden_p * (4 * itemsize + 8)       # pipeline buffers + f32 upcast + f32 product
    max_rows = max(sub, (tile_budget_bytes // per_row) // sub * sub)
    rows_up = pl.cdiv(rows, sub) * sub            # never make the tile larger than the data
    return max(sub, min(row_cap, max_rows, rows_up))


def _call_rmsnorm(x2d, w2d, *, eps, inv_hidden, block_rows, hidden_p, rows, dtype,
                  vmem_limit, dim_sem, weight_pipeline_mode):
    itemsize = jnp.dtype(dtype).itemsize
    wspec_kwargs = {}
    if weight_pipeline_mode is not None:
        wspec_kwargs["pipeline_mode"] = weight_pipeline_mode
    kernel = functools.partial(_rmsnorm_kernel, eps=eps, inv_hidden=inv_hidden)
    return pl.pallas_call(
        kernel,
        out_shape=jax.ShapeDtypeStruct((rows, hidden_p), dtype),
        grid_spec=pltpu.PrefetchScalarGridSpec(
            num_scalar_prefetch=0,
            grid=(pl.cdiv(rows, block_rows),),     # tail block handled by masked partial stores
            in_specs=[
                pl.BlockSpec((block_rows, hidden_p), lambda i: (i, 0)),
                pl.BlockSpec((1, hidden_p), lambda i: (0, 0), **wspec_kwargs),
            ],
            out_specs=pl.BlockSpec((block_rows, hidden_p), lambda i: (i, 0)),
        ),
        compiler_params=pltpu.CompilerParams(
            dimension_semantics=(dim_sem,),
            vmem_limit_bytes=vmem_limit,
        ),
        cost_estimate=pl.CostEstimate(
            flops=3 * rows * hidden_p,
            transcendentals=rows,
            bytes_accessed=2 * rows * hidden_p * itemsize + hidden_p * 4,
        ),
    )(x2d, w2d)


def llama_rmsnorm(hidden_states, weight, eps=1e-6, block_rows=None, core_parallel=None):
    """hidden_states: (..., hidden); weight: (hidden,). Returns input dtype."""
    orig_shape = hidden_states.shape
    hidden = orig_shape[-1]
    dtype = hidden_states.dtype
    itemsize = jnp.dtype(dtype).itemsize

    x2d = hidden_states.reshape(-1, hidden)
    rows = x2d.shape[0]

    # Lane-dense padding: pad the hidden axis to a multiple of 128 so the output
    # store stays unmasked. Zero padding is correct because the reduction uses
    # sum(x^2) * (1/true_hidden) and padded lanes are sliced off afterwards.
    hidden_p = max(128, pl.cdiv(hidden, 128) * 128)
    pad = hidden_p - hidden
    if pad:
        x2d = jnp.pad(x2d, ((0, 0), (0, pad)))
    # Hoist the weight cast out of the kernel: one tiny XLA cast instead of per-tile VPU work.
    w2d = weight.astype(jnp.float32).reshape(1, hidden)
    if pad:
        w2d = jnp.pad(w2d, ((0, 0), (0, pad)))

    # Generation-aware VMEM budgeting with >=25% headroom.
    capacity = _vmem_capacity_bytes()
    tile_budget = capacity // 3                      # ~21 MiB on v7x, ~42 MiB on v5e/v6e
    row_cap = 512 if capacity <= 64 * 1024 * 1024 else 1024

    sub = _sublane(dtype)
    if block_rows is None:
        block_rows = _pick_block_rows(rows, hidden_p, dtype, tile_budget, row_cap)
    assert block_rows % sub == 0, "block_rows must be a multiple of the packed sublane tile"

    # Full per-step working set: 2x in + 2x out buffers + ~2 live f32 temps + weight.
    step_bytes = block_rows * hidden_p * (4 * itemsize + 8) + 2 * hidden_p * 4
    vmem_limit = int(min(max(step_bytes + (8 << 20), 32 << 20), (capacity * 3) // 4))

    inv_hidden = 1.0 / float(hidden)

    if core_parallel is None:
        core_parallel = _tensorcores_per_chip() >= 2
    par_sem = getattr(pltpu, "CORE_PARALLEL", "parallel") if core_parallel else "parallel"

    # Candidate configs, best first. Optional features (single-buffered weight,
    # CORE_PARALLEL) are dropped gracefully if this jax/mosaic build rejects them,
    # so the kernel always compiles and runs. (Fallback triggers on eager calls.)
    weight_modes = []
    if hasattr(pl, "Buffered"):
        weight_modes.append(pl.Buffered(1))          # constant index_map -> no 2nd buffer needed
    weight_modes.append(None)
    candidates = [(par_sem, wm) for wm in weight_modes]
    if par_sem != "parallel":
        candidates += [("parallel", wm) for wm in weight_modes]

    out = None
    last_err = None
    for dim_sem, wm in candidates:
        try:
            out = _call_rmsnorm(x2d, w2d, eps=eps, inv_hidden=inv_hidden,
                                block_rows=block_rows, hidden_p=hidden_p, rows=rows,
                                dtype=dtype, vmem_limit=vmem_limit,
                                dim_sem=dim_sem, weight_pipeline_mode=wm)
            break
        except Exception as e:                       # optional feature rejected -> next config
            last_err = e
    if out is None:
        raise last_err

    if pad:
        out = out[:, :hidden]
    return out.reshape(orig_shape)


def _reference_rmsnorm(hidden_states, weight, eps=1e-6):
    input_dtype = hidden_states.dtype
    x = hidden_states.astype(jnp.float32)
    var = jnp.mean(x * x, axis=-1, keepdims=True)
    x = x * jax.lax.rsqrt(var + eps)
    # Same convention as the kernel: scale in f32, cast once to input dtype.
    return (weight.astype(jnp.float32) * x).astype(input_dtype)


if __name__ == "__main__":
    key = jax.random.PRNGKey(0)

    # Test 1: float32, small shape consistent with the module (batch=2, seq=8, hidden=32).
    # hidden=32 exercises the lane-padding path (padded to 128 inside the wrapper).
    batch, seq, hidden = 2, 8, 32
    x = jax.random.normal(key, (batch, seq, hidden), dtype=jnp.float32)
    weight = jnp.ones((hidden,), dtype=jnp.float32)   # nn.Parameter(torch.ones(hidden_size))

    out = jax.block_until_ready(llama_rmsnorm(x, weight, eps=1e-6))
    ref = _reference_rmsnorm(x, weight, eps=1e-6)
    assert out.shape == x.shape and out.dtype == x.dtype
    assert jnp.allclose(out, ref, atol=1e-5, rtol=1e-5)

    # Test 2: bfloat16 (16-row packed sublane tile) with a row count that is NOT a
    # multiple of the block (exercises the cdiv / masked-tail path), lane-dense H=128.
    b2, s2, h2 = 3, 8, 128                            # rows = 24, block_rows = 16 -> grid = 2
    k1, k2 = jax.random.split(key)
    xb = jax.random.normal(k1, (b2, s2, h2), dtype=jnp.float32).astype(jnp.bfloat16)
    wb = 1.0 + 0.1 * jax.random.normal(k2, (h2,), dtype=jnp.float32)

    outb = jax.block_until_ready(llama_rmsnorm(xb, wb, eps=1e-6, block_rows=16))
    refb = _reference_rmsnorm(xb, wb, eps=1e-6)
    assert outb.shape == xb.shape and outb.dtype == xb.dtype
    assert jnp.allclose(outb.astype(jnp.float32), refb.astype(jnp.float32),
                        atol=2e-2, rtol=2e-2)

    print("KERNEL_OK")
</pallas_src>

<mosaic_0001>
module attributes {stable_mosaic.version = 11 : i64} {
  func.func @_rmsnorm_kernel(%arg0: i32, %arg1: memref<16x128xf32, #tpu.memory_space<vmem>>, %arg2: memref<1x128xf32, #tpu.memory_space<vmem>>, %arg3: memref<16x128xf32, #tpu.memory_space<vmem>>) attributes {dimension_semantics = [#tpu.dimension_semantics<parallel>], iteration_bounds = array<i64: 1>, scalar_prefetch = 0 : i64, scratch_operands = 0 : i64, tpu.core_type = #tpu.core_type<tc>, window_params = [{transform_indices = @transform_0, window_bounds = array<i64: 16, 128>}, {pipeline_mode = #tpu.pipeline_mode<synchronous>, transform_indices = @transform_1, window_bounds = array<i64: 1, 128>}, {transform_indices = @transform_2, window_bounds = array<i64: 16, 128>}]} {
    %c0 = arith.constant 0 : index
    %c0_0 = arith.constant 0 : index
    %0 = vector.load %arg1[%c0, %c0_0] : memref<16x128xf32, #tpu.memory_space<vmem>>, vector<16x128xf32>
    %1 = arith.mulf %0, %0 : vector<16x128xf32>
    %cst = arith.constant dense<0.000000e+00> : vector<16xf32>
    %2 = vector.multi_reduction <add>, %1, %cst [1] : vector<16x128xf32> to vector<16xf32>
    %3 = vector.shape_cast %2 : vector<16xf32> to vector<16x1xf32>
    %cst_1 = arith.constant 3.125000e-02 : f32
    %4 = vector.broadcast %cst_1 : f32 to vector<16x1xf32>
    %5 = arith.mulf %3, %4 : vector<16x1xf32>
    %cst_2 = arith.constant 9.99999997E-7 : f32
    %6 = vector.broadcast %cst_2 : f32 to vector<16x1xf32>
    %7 = arith.addf %5, %6 : vector<16x1xf32>
    %8 = math.rsqrt %7 : vector<16x1xf32>
    %c0_3 = arith.constant 0 : index
    %c0_4 = arith.constant 0 : index
    %9 = vector.load %arg2[%c0_3, %c0_4] : memref<1x128xf32, #tpu.memory_space<vmem>>, vector<1x128xf32>
    %10 = vector.broadcast %8 : vector<16x1xf32> to vector<16x128xf32>
    %11 = arith.mulf %0, %10 : vector<16x128xf32>
    %12 = vector.broadcast %9 : vector<1x128xf32> to vector<16x128xf32>
    %13 = arith.mulf %12, %11 : vector<16x128xf32>
    %c0_5 = arith.constant 0 : index
    %c0_6 = arith.constant 0 : index
    %14 = vector.load %arg3[%c0_5, %c0_6] : memref<16x128xf32, #tpu.memory_space<vmem>>, vector<16x128xf32>
    tpu.vector_store %arg3[%c0_5, %c0_6], %13 {strides = array<i32>} : memref<16x128xf32, #tpu.memory_space<vmem>>, vector<16x128xf32>,
    return
  }
  func.func @transform_0(%arg0: i32) -> (i32, i32) {
    %c0_i32 = arith.constant 0 : i32
    %c0_i32_0 = arith.constant 0 : i32
    return %arg0, %c0_i32 : i32, i32
  }
  func.func @transform_1(%arg0: i32) -> (i32, i32) {
    %c0_i32 = arith.constant 0 : i32
    %c0_i32_0 = arith.constant 0 : i32
    %c0_i32_1 = arith.constant 0 : i32
    return %c0_i32, %c0_i32_0 : i32, i32
  }
  func.func @transform_2(%arg0: i32) -> (i32, i32) {
    %c0_i32 = arith.constant 0 : i32
    %c0_i32_0 = arith.constant 0 : i32
    return %arg0, %c0_i32 : i32, i32
  }
}

module attributes {stable_mosaic.version = 11 : i64} {
  func.func @_rmsnorm_kernel(%arg0: i32, %arg1: memref<16x128xf32, #tpu.memory_space<vmem>>, %arg2: memref<1x128xf32, #tpu.memory_space<vmem>>, %arg3: memref<16x128xf32, #tpu.memory_space<vmem>>) attributes {dimension_semantics = [#tpu.dimension_semantics<parallel>], iteration_bounds = array<i64: 1>, scalar_prefetch = 0 : i64, scratch_operands = 0 : i64, tpu.core_type = #tpu.core_type<tc>, window_params = [{transform_indices = @transform_0, window_bounds = array<i64: 16, 128>}, {pipeline_mode = #tpu.pipeline_mode<synchronous>, transform_indices = @transform_1, window_bounds = array<i64: 1, 128>}, {transform_indices = @transform_2, window_bounds = array<i64: 16, 128>}]} {
    %c0 = arith.constant 0 : index
    %c0_0 = arith.constant 0 : index
    %0 = vector.load %arg1[%c0, %c0_0] : memref<16x128xf32, #tpu.memory_space<vmem>>, vector<16x128xf32>
    %1 = arith.mulf %0, %0 : vector<16x128xf32>
    %cst = arith.constant dense<0.000000e+00> : vector<16xf32>
    %2 = vector.multi_reduction <add>, %1, %cst [1] : vector<16x128xf32> to vector<16xf32>
    %3 = vector.shape_cast %2 : vector<16xf32> to vector<16x1xf32>
    %cst_1 = arith.constant 3.125000e-02 : f32
    %4 = vector.broadcast %cst_1 : f32 to vector<16x1xf32>
    %5 = arith.mulf %3, %4 : vector<16x1xf32>
    %cst_2 = arith.constant 9.99999997E-7 : f32
    %6 = vector.broadcast %cst_2 : f32 to vector<16x1xf32>
    %7 = arith.addf %5, %6 : vector<16x1xf32>
    %8 = math.rsqrt %7 : vector<16x1xf32>
    %c0_3 = arith.constant 0 : index
    %c0_4 = arith.constant 0 : index
    %9 = vector.load %arg2[%c0_3, %c0_4] : memref<1x128xf32, #tpu.memory_space<vmem>>, vector<1x128xf32>
    %10 = vector.broadcast %8 : vector<16x1xf32> to vector<16x128xf32>
    %11 = arith.mulf %0, %10 : vector<16x128xf32>
    %12 = vector.broadcast %9 : vector<1x128xf32> to vector<16x128xf32>
    %13 = arith.mulf %12, %11 : vector<16x128xf32>
    %c0_5 = arith.constant 0 : index
    %c0_6 = arith.constant 0 : index
    %14 = vector.load %arg3[%c0_5, %c0_6] : memref<16x128xf32, #tpu.memory_space<vmem>>, vector<16x128xf32>
    tpu.vector_store %arg3[%c0_5, %c0_6], %13 {strides = array<i32>} : memref<16x128xf32, #tpu.memory_space<vmem>>, vector<16x128xf32>,
    return
  }
  func.func @transform_0(%arg0: i32) -> (i32, i32) {
    %c0_i32 = arith.constant 0 : i32
    %c0_i32_0 = arith.constant 0 : i32
    return %arg0, %c0_i32 : i32, i32
  }
  func.func @transform_1(%arg0: i32) -> (i32, i32) {
    %c0_i32 = arith.constant 0 : i32
    %c0_i32_0 = arith.constant 0 : i32
    %c0_i32_1 = arith.constant 0 : i32
    return %c0_i32, %c0_i32_0 : i32, i32
  }
  func.func @transform_2(%arg0: i32) -> (i32, i32) {
    %c0_i32 = arith.constant 0 : i32
    %c0_i32_0 = arith.constant 0 : i32
    return %arg0, %c0_i32 : i32, i32
  }
}

</mosaic_0001>

<bundles_post_ra>
// kernel: tpu_custom_call.1
= control target key start
LH: loop header
LB: loop body
LE: loop exit
PB: predicated region body
PF: predicated region fallthrough
CT: control target
= control target key end

     0   :  { %7 = vsyncpa [#allocation3], 0  ;;  %s179_s0 = inlined_call_operand.hbm [shape: f32[16,128], index: 0, kind: input, shape index: {}]   ;;  %s180_s1 = inlined_call_operand.vmem [shape: f32[1,128], index: 1, kind: input, shape index: {}]   ;;  %s181_s2 = inlined_call_operand.hbm [shape: f32[16,128], index: 2, kind: output, shape index: {}]  }
   0x1   :  { %8 = vsyncpa [#allocation4], 0  ;;  %s127_s9 = smov [#allocation2]   ;;  %s79_s13 = scalar_lea.hbm %s179_s0, 256 }
   0x2   :  { %s14_s10 = sshll.u32 %s127_s9, 4  ;;  %p80_p0 = scmp.ne.s32.totalorder %s179_s0, %s79_s13  ;;  %s15_s10 = int_to_ptr.vmem [resolvable:$true] %s14_s10 }
   0x3   :  { %p83_p1 = scmp.lt.u32.totalorder %s79_s13, %s179_s0 }
   0x5   :  { %p85_p2 = pnand %p83_p1, %p80_p0 }
   0x7   :  { %88 = shalt.err (!%p85_p2)
}
   0x8   :  { %s89_s18 = scalar_lea.vmem %s15_s10, 256  ;;  %p94_p4 = scmp.lt.s32.totalorder %s15_s10, %s15_s10 }
   0x9   :  { %p90_p3 = scmp.ne.s32.totalorder %s15_s10, %s89_s18  ;;  %p95_p5 = scmp.lt.s32.totalorder %s89_s18, %s89_s18 }
   0xb   :  { %p96_p6 = por %p95_p5, %p94_p4 }
   0xd   :  { %p97_p7 = pnand %p96_p6, %p90_p3 }
   0xf   :  { %100 = shalt.err (!%p97_p7)
}
  0x10   :  { %s128_s19 = smov 128   ;;  %s129_s20 = smov 8  }
  0x11   :  { %20 = dma.hbm_to_vmem [thread:$0]  %s179_s0, 256, %s15_s10, [#allocation3], %s128_s19, %s128_s19, %s129_s20  }
  0x12   :  { %123 = dma.done.wait [#allocation3], 256  }
  0x13   :  { %124 = vsyncadd [#allocation3], 4294967040  ;;  %v26_v0 = vld [vmem:[#allocation2] sm:$0xff]  ;;  %v27_v1 = vld [vmem:[#allocation2 + $0x8] sm:$0xff]  ;;  %s130_s0 = smov [#allocation5]  }
  0x14   :  { %v28_v2 = vmul.f32 %v26_v0, %v26_v0  ;;  %v29_v3 = vmul.f32 %v27_v1, %v27_v1  ;;  %v70_v11 = vld [vmem:[%s180_s1] ss:$0 sm:$0xff]  ;;  %s58_s25 = sshll.u32 %s130_s0, 4  ;;  %s59_s25 = int_to_ptr.vmem [resolvable:$true] %s58_s25 }
  0x15   :  { %s101_s26 = scalar_lea.vmem %s59_s25, 256  ;;  %p106_p9 = scmp.lt.s32.totalorder %s59_s25, %s59_s25 }
  0x16   :  { %30 = vadd.xlane.f32.xlu0 %v28_v2  ;;  %p102_p8 = scmp.ne.s32.totalorder %s59_s25, %s101_s26  ;;  %p107_p10 = scmp.lt.s32.totalorder %s101_s26, %s101_s26 }
  0x18   :  { %p108_p11 = por %p107_p10, %p106_p9 }
  0x1a   :  { %32 = vadd.xlane.f32.xlu0 %v29_v3  ;;  %p109_p12 = pnand %p108_p11, %p102_p8 }
  0xa3   :  { %v31_v4 = vpop.xlane.xlu0 %30 }
  0xa4   :  { %v34_v5 = vmul.f32 0.03125, %v31_v4 }
  0xa6   :  { %v36_v6 = vadd.f32 1e-06, %v34_v5 }
  0xa7   :  { %v33_v7 = vpop.xlane.xlu0 %32 }
  0xa8   :  { %75 = vrsqrt.f32 %v36_v6  ;;  %v35_v8 = vmul.f32 0.03125, %v33_v7 }
  0xaa   :  { %v37_v9 = vadd.f32 1e-06, %v35_v8 }
  0xac   :  { %77 = vrsqrt.f32 %v37_v9 }
  0xb2   :  { %v76_v10 = vpop.eup %75 }
  0xb3   :  { %v41_v12 = vmul.f32 %v76_v10, %v26_v0 }
  0xb5   :  { %v49_v13 = vmul.f32 %v70_v11, %v41_v12 }
  0xb6   :  { %v78_v14 = vpop.eup %77 }
  0xb7   :  { %v42_v15 = vmul.f32 %v78_v14, %v27_v1  ;;  %51 = vst [vmem:[#allocation5] sm:$0xff] %v49_v13 }
  0xb9   :  { %v50_v16 = vmul.f32 %v70_v11, %v42_v15 }
  0xbb   :  { %52 = vst [vmem:[#allocation5 + $0x8] sm:$0xff] %v50_v16 }
  0xbc   :  { %112 = shalt.err (!%p109_p12)
}
  0xbd   :  { %s113_s1 = scalar_lea.hbm %s181_s2, 256 }
  0xbe   :  { %p114_p13 = scmp.ne.s32.totalorder %s181_s2, %s113_s1  ;;  %p117_p0 = scmp.lt.u32.totalorder %s113_s1, %s181_s2 }
  0xc0   :  { %p119_p1 = pnand %p117_p0, %p114_p13 }
  0xc2   :  { %122 = shalt.err (!%p119_p1)
}
  0xc3   :  { %64 = dma.vmem_to_hbm [thread:$0]  %s59_s25, 256, %s181_s2, [#allocation4], %s128_s19, %s128_s19, %s129_s20  }
  0xc4   :  { %125 = dma.done.wait [#allocation4], 256  }
  0xc5   :  { %126 = vsyncadd [#allocation4], 4294967040 }
  0xc6   :  { %68 = vsyncpa [#allocation3], 1 }
  0xc7   :  { %69 = vsyncpa [#allocation4], 1 }

// kernel: tpu_custom_call.1
= control target key start
LH: loop header
LB: loop body
LE: loop exit
PB: predicated region body
PF: predicated region fallthrough
CT: control target
= control target key end

     0   :  { %7 = vsyncpa [#allocation3], 0  ;;  %s179_s0 = inlined_call_operand.hbm [shape: f32[16,128], index: 0, kind: input, shape index: {}]   ;;  %s180_s1 = inlined_call_operand.vmem [shape: f32[1,128], index: 1, kind: input, shape index: {}]   ;;  %s181_s2 = inlined_call_operand.hbm [shape: f32[16,128], index: 2, kind: output, shape index: {}]  }
   0x1   :  { %8 = vsyncpa [#allocation4], 0  ;;  %s127_s9 = smov [#allocation2]   ;;  %s79_s13 = scalar_lea.hbm %s179_s0, 256 }
   0x2   :  { %s14_s10 = sshll.u32 %s127_s9, 4  ;;  %p80_p0 = scmp.ne.s32.totalorder %s179_s0, %s79_s13  ;;  %s15_s10 = int_to_ptr.vmem [resolvable:$true] %s14_s10 }
   0x3   :  { %p83_p1 = scmp.lt.u32.totalorder %s79_s13, %s179_s0 }
   0x5   :  { %p85_p2 = pnand %p83_p1, %p80_p0 }
   0x7   :  { %88 = shalt.err (!%p85_p2)
}
   0x8   :  { %s89_s18 = scalar_lea.vmem %s15_s10, 256  ;;  %p94_p4 = scmp.lt.s32.totalorder %s15_s10, %s15_s10 }
   0x9   :  { %p90_p3 = scmp.ne.s32.totalorder %s15_s10, %s89_s18  ;;  %p95_p5 = scmp.lt.s32.totalorder %s89_s18, %s89_s18 }
   0xb   :  { %p96_p6 = por %p95_p5, %p94_p4 }
   0xd   :  { %p97_p7 = pnand %p96_p6, %p90_p3 }
   0xf   :  { %100 = shalt.err (!%p97_p7)
}
  0x10   :  { %s128_s19 = smov 128   ;;  %s129_s20 = smov 8  }
  0x11   :  { %20 = dma.hbm_to_vmem [thread:$0]  %s179_s0, 256, %s15_s10, [#allocation3], %s128_s19, %s128_s19, %s129_s20  }
  0x12   :  { %123 = dma.done.wait [#allocation3], 256  }
  0x13   :  { %124 = vsyncadd [#allocation3], 4294967040  ;;  %v26_v0 = vld [vmem:[#allocation2] sm:$0xff]  ;;  %v27_v1 = vld [vmem:[#allocation2 + $0x8] sm:$0xff]  ;;  %s130_s0 = smov [#allocation5]  }
  0x14   :  { %v28_v2 = vmul.f32 %v26_v0, %v26_v0  ;;  %v29_v3 = vmul.f32 %v27_v1, %v27_v1  ;;  %v70_v11 = vld [vmem:[%s180_s1] ss:$0 sm:$0xff]  ;;  %s58_s25 = sshll.u32 %s130_s0, 4  ;;  %s59_s25 = int_to_ptr.vmem [resolvable:$true] %s58_s25 }
  0x15   :  { %s101_s26 = scalar_lea.vmem %s59_s25, 256  ;;  %p106_p9 = scmp.lt.s32.totalorder %s59_s25, %s59_s25 }
  0x16   :  { %30 = vadd.xlane.f32.xlu0 %v28_v2  ;;  %p102_p8 = scmp.ne.s32.totalorder %s59_s25, %s101_s26  ;;  %p107_p10 = scmp.lt.s32.totalorder %s101_s26, %s101_s26 }
  0x18   :  { %p108_p11 = por %p107_p10, %p106_p9 }
  0x1a   :  { %32 = vadd.xlane.f32.xlu0 %v29_v3  ;;  %p109_p12 = pnand %p108_p11, %p102_p8 }
  0xa3   :  { %v31_v4 = vpop.xlane.xlu0 %30 }
  0xa4   :  { %v34_v5 = vmul.f32 0.03125, %v31_v4 }
  0xa6   :  { %v36_v6 = vadd.f32 1e-06, %v34_v5 }
  0xa7   :  { %v33_v7 = vpop.xlane.xlu0 %32 }
  0xa8   :  { %75 = vrsqrt.f32 %v36_v6  ;;  %v35_v8 = vmul.f32 0.03125, %v33_v7 }
  0xaa   :  { %v37_v9 = vadd.f32 1e-06, %v35_v8 }
  0xac   :  { %77 = vrsqrt.f32 %v37_v9 }
  0xb2   :  { %v76_v10 = vpop.eup %75 }
  0xb3   :  { %v41_v12 = vmul.f32 %v76_v10, %v26_v0 }
  0xb5   :  { %v49_v13 = vmul.f32 %v70_v11, %v41_v12 }
  0xb6   :  { %v78_v14 = vpop.eup %77 }
  0xb7   :  { %v42_v15 = vmul.f32 %v78_v14, %v27_v1  ;;  %51 = vst [vmem:[#allocation5] sm:$0xff] %v49_v13 }
  0xb9   :  { %v50_v16 = vmul.f32 %v70_v11, %v42_v15 }
  0xbb   :  { %52 = vst [vmem:[#allocation5 + $0x8] sm:$0xff] %v50_v16 }
  0xbc   :  { %112 = shalt.err (!%p109_p12)
}
  0xbd   :  { %s113_s1 = scalar_lea.hbm %s181_s2, 256 }
  0xbe   :  { %p114_p13 = scmp.ne.s32.totalorder %s181_s2, %s113_s1  ;;  %p117_p0 = scmp.lt.u32.totalorder %s113_s1, %s181_s2 }
  0xc0   :  { %p119_p1 = pnand %p117_p0, %p114_p13 }
  0xc2   :  { %122 = shalt.err (!%p119_p1)
}
  0xc3   :  { %64 = dma.vmem_to_hbm [thread:$0]  %s59_s25, 256, %s181_s2, [#allocation4], %s128_s19, %s128_s19, %s129_s20  }
  0xc4   :  { %125 = dma.done.wait [#allocation4], 256  }
  0xc5   :  { %126 = vsyncadd [#allocation4], 4294967040 }
  0xc6   :  { %68 = vsyncpa [#allocation3], 1 }
  0xc7   :  { %69 = vsyncpa [#allocation4], 1 }

</bundles_post_ra>
